<compile_context>
chip_gen: v6e
topology: v6e:2x2x1
jax: 0.10.0
libtpu: 0.0.40
codegen_flags: <defaults>
</compile_context>

<pallas_src>
import math

import jax
import jax.numpy as jnp
from jax.experimental import pallas as pl
from jax.experimental.pallas import tpu as pltpu

# ----- problem sizes (small, consistent with the module) -----
B, S, D = 2, 8, 32          # batch, seq, input_size
H = 4                       # attn_heads
HD = D // H                 # head dim = 8
HIDDEN = 48                 # hidden_size
TARGET = round(2 * HIDDEN / 3)   # round(2*hidden/3) = 32  (SwiGLU output width)
EPS = 1e-5
ROPE_BASE = 10000.0
N = B * S                   # 16 token rows
SCALE = 1.0 / math.sqrt(HD)
FUSED = 4 * D + H * D       # 256 fused projection columns


def _llama_block_kernel(x_ref, cos_ref, sin_ref, bias_ref,
                        g1_ref, wfused_ref, g2_ref, wsg_ref, wff2_ref,
                        o_ref):
    x = x_ref[...]                                        # (S, D) f32, one batch element

    # ---------------- RMSNorm 1 (f32 elementwise) ----------------
    h = x * jax.lax.rsqrt(jnp.mean(x * x, axis=-1, keepdims=True) + EPS) * g1_ref[...]

    # ---------------- single fused, lane-dense projection ----------------
    # columns: [ q*scale | k | rotate_half(q)*scale | rotate_half(k) | per-head Wv@Wo ]
    fused = jnp.dot(h.astype(jnp.bfloat16), wfused_ref[...],
                    preferred_element_type=jnp.float32)   # (S, 4D + H*D) f32

    cosf = cos_ref[...]                                   # (S, D) f32
    sinf = sin_ref[...]

    # RoPE is purely elementwise now (rotate_half + softmax scale pre-folded).
    q = fused[:, 0 * D:1 * D] * cosf + fused[:, 2 * D:3 * D] * sinf    # (S, D)
    k = fused[:, 1 * D:2 * D] * cosf + fused[:, 3 * D:4 * D] * sinf    # (S, D)
    vproj = fused[:, 4 * D:]                               # (S, H*D): per-head (Wv@Wo) values

    # ---------------- attention (heads batched on a leading axis) ----------------
    qh = jnp.stack([q[:, i * HD:(i + 1) * HD] for i in range(H)], axis=0)      # (H, S, HD)
    kh = jnp.stack([k[:, i * HD:(i + 1) * HD] for i in range(H)], axis=0)      # (H, S, HD)
    vh = jnp.stack([vproj[:, i * D:(i + 1) * D] for i in range(H)], axis=0)    # (H, S, D)

    s = jnp.einsum('hqd,hkd->hqk',
                   qh.astype(jnp.bfloat16), kh.astype(jnp.bfloat16),
                   preferred_element_type=jnp.float32)     # (H, S, S); scale already folded
    s = s + bias_ref[...][None, :, :]                      # causal additive mask (S, S)
    s = s - jnp.max(s, axis=-1, keepdims=True)
    p = jnp.exp(s)
    p = p * pl.reciprocal(jnp.sum(p, axis=-1, keepdims=True), approx=True)

    # Wo already folded into vproj: attn = sum_h p_h @ vproj_h
    attn = jnp.einsum('hqk,hkd->hqd',
                      p.astype(jnp.bfloat16), vh.astype(jnp.bfloat16),
                      preferred_element_type=jnp.float32)  # (H, S, D)
    x = x + jnp.sum(attn, axis=0)                          # residual 1

    # ---------------- RMSNorm 2 + SwiGLU FFN ----------------
    h2 = x * jax.lax.rsqrt(jnp.mean(x * x, axis=-1, keepdims=True) + EPS) * g2_ref[...]
    z = jnp.dot(h2.astype(jnp.bfloat16), wsg_ref[...],
                preferred_element_type=jnp.float32)        # (S, 2*TARGET)
    a = z[:, :TARGET]
    b = z[:, TARGET:]
    gated = (a * jax.nn.sigmoid(a)) * b                    # SwiGLU = silu(x Wa) * (x Wb), f32
    ff = jnp.dot(gated.astype(jnp.bfloat16), wff2_ref[...],
                 preferred_element_type=jnp.float32)       # (S, D)

    o_ref[...] = x + ff                                    # residual 2


def prepare_llama_block(params, cos_sd, sin_sd):
    """Once-per-model host prep: algebraic weight folds, bf16 casts, RoPE tables, causal mask."""
    g1, wq, wk, wv, wo, g2, w_sg, w_ff2 = params

    # rotate_half(t) == t @ rot, with rot a block-diagonal +/-1 permutation (one HDxHD block/head)
    half = HD // 2
    base = jnp.block([[jnp.zeros((half, half)), jnp.eye(half)],
                      [-jnp.eye(half), jnp.zeros((half, half))]])
    rot = jnp.kron(jnp.eye(H), base).astype(jnp.float32)           # (D, D)

    wq_s = wq * SCALE                                              # fold 1/sqrt(HD) into q
    wvo = jnp.concatenate(                                         # (D, H*D): per-head Wv @ Wo
        [wv[:, i * HD:(i + 1) * HD] @ wo[i * HD:(i + 1) * HD, :] for i in range(H)],
        axis=1)
    wfused = jnp.concatenate([wq_s, wk, wq_s @ rot, wk @ rot, wvo],
                             axis=1).astype(jnp.bfloat16)          # (D, 256)

    cosf = jnp.tile(cos_sd, (1, H)).astype(jnp.float32)            # (S, D)
    sinf = jnp.tile(sin_sd, (1, H)).astype(jnp.float32)

    tri = jnp.tril(jnp.ones((S, S), dtype=bool))
    bias = jnp.where(tri, 0.0, -1e30).astype(jnp.float32)          # (S, S) causal additive mask

    return (cosf, sinf, bias,
            g1.astype(jnp.float32), wfused,
            g2.astype(jnp.float32),
            w_sg.astype(jnp.bfloat16), w_ff2.astype(jnp.bfloat16))


def llama_block(x, prep):
    """x: (B, S, D) f32; prep: output of prepare_llama_block (cached per model)."""
    cosf, sinf, bias, g1, wfused, g2, wsg, wff2 = prep
    x2 = x.reshape(N, D).astype(jnp.float32)

    out = pl.pallas_call(
        _llama_block_kernel,
        out_shape=jax.ShapeDtypeStruct((N, D), jnp.float32),
        grid=(B,),
        in_specs=[
            pl.BlockSpec((S, D), lambda b: (b, 0)),          # x rows for batch b
            pl.BlockSpec((S, D), lambda b: (0, 0)),          # cos table
            pl.BlockSpec((S, D), lambda b: (0, 0)),          # sin table
            pl.BlockSpec((S, S), lambda b: (0, 0)),          # causal bias
            pl.BlockSpec((1, D), lambda b: (0, 0)),          # RMSNorm1 gain
            pl.BlockSpec((D, FUSED), lambda b: (0, 0)),      # fused projection weight (bf16)
            pl.BlockSpec((1, D), lambda b: (0, 0)),          # RMSNorm2 gain
            pl.BlockSpec((D, 2 * TARGET), lambda b: (0, 0)),  # SwiGLU weight (bf16)
            pl.BlockSpec((TARGET, D), lambda b: (0, 0)),     # FFN down-proj (bf16)
        ],
        out_specs=pl.BlockSpec((S, D), lambda b: (b, 0)),
        compiler_params=pltpu.CompilerParams(
            dimension_semantics=("parallel",)),              # 2 TCs on v7x; trivial elsewhere
    )(x2, cosf, sinf, bias, g1, wfused, g2, wsg, wff2)
    return out.reshape(B, S, D)


# ------------------ pure-JAX f32 reference (module semantics) ------------------
def _ref_block(x, params, cos, sin):
    g1, wq, wk, wv, wo, g2, w_sg, w_ff2 = params

    def rmsnorm(t, g):
        return t * jax.lax.rsqrt(jnp.mean(t * t, -1, keepdims=True) + EPS) * g

    def rope(t):  # t: (B, S, H, HD)
        t1, t2 = t[..., :HD // 2], t[..., HD // 2:]
        rot = jnp.concatenate([-t2, t1], axis=-1)
        return t * cos[None, :, None, :] + rot * sin[None, :, None, :]

    h = rmsnorm(x, g1)
    q = (h @ wq).reshape(B, S, H, HD)
    k = (h @ wk).reshape(B, S, H, HD)
    v = (h @ wv).reshape(B, S, H, HD)
    q, k = rope(q), rope(k)
    s = jnp.einsum('bqhd,bkhd->bhqk', q, k) / math.sqrt(HD)
    mask = jnp.tril(jnp.ones((S, S), bool))
    s = jnp.where(mask, s, -1e30)
    p = jax.nn.softmax(s, axis=-1)
    attn = jnp.einsum('bhqk,bkhd->bqhd', p, v).reshape(B, S, D) @ wo
    x = x + attn
    z = rmsnorm(x, g2) @ w_sg
    a, b = z[..., :TARGET], z[..., TARGET:]
    return x + (jax.nn.silu(a) * b) @ w_ff2


if __name__ == "__main__":
    key = jax.random.PRNGKey(0)
    ks = jax.random.split(key, 8)

    x = jax.random.normal(ks[0], (B, S, D), jnp.float32)

    def init(k, shape, fan_in):
        return jax.random.normal(k, shape, jnp.float32) / math.sqrt(fan_in)

    g1 = jnp.ones((1, D), jnp.float32)
    g2 = jnp.ones((1, D), jnp.float32)
    wq = init(ks[1], (D, D), D)
    wk = init(ks[2], (D, D), D)
    wv = init(ks[3], (D, D), D)
    wo = init(ks[4], (D, D), D)
    w_sg = init(ks[5], (D, 2 * TARGET), D)      # SwiGLU(input_size, 2*target, bias=False)
    w_ff2 = init(ks[6], (TARGET, D), TARGET)    # Linear(target, input_size, bias=False)
    params = (g1, wq, wk, wv, wo, g2, w_sg, w_ff2)

    # rotary tables (start_pos = 0), HF rotate-half convention
    inv_freq = 1.0 / (ROPE_BASE ** (jnp.arange(0, HD, 2, dtype=jnp.float32) / HD))
    pos = jnp.arange(S, dtype=jnp.float32)
    ang = pos[:, None] * inv_freq[None, :]                           # (S, HD/2)
    cos_sd = jnp.concatenate([jnp.cos(ang), jnp.cos(ang)], axis=-1)  # (S, HD)
    sin_sd = jnp.concatenate([jnp.sin(ang), jnp.sin(ang)], axis=-1)

    prep = prepare_llama_block(params, cos_sd, sin_sd)   # built once per model, reused per call
    out = jax.block_until_ready(llama_block(x, prep))
    ref = _ref_block(x, params, cos_sd, sin_sd)

    assert out.shape == (B, S, D)
    # Tolerance accounts for bf16 MXU operands (f32 accumulation) and the EUP
    # approximate reciprocal in the softmax normalization; the math is otherwise
    # identical (weight folds are exact algebra done in f32 on the host).
    err = float(jnp.max(jnp.abs(out - ref)))
    assert jnp.allclose(out, ref, atol=5e-2, rtol=5e-2), f"max abs err {err}"

    # TODO(synk): KVCache (use_cache=True), flash attention, and the
    # GroupedQueryAttention branch are not exercised by this forward
    # (start_pos=0, use_cache=False, flash=False, attn_kv_groups=None).
    print("KERNEL_OK")
</pallas_src>

<mosaic_0001>
module attributes {stable_mosaic.version = 11 : i64} {
  func.func @_llama_block_kernel(%arg0: i32, %arg1: memref<8x32xf32, #tpu.memory_space<vmem>>, %arg2: memref<8x32xf32, #tpu.memory_space<vmem>>, %arg3: memref<8x32xf32, #tpu.memory_space<vmem>>, %arg4: memref<8x8xf32, #tpu.memory_space<vmem>>, %arg5: memref<1x32xf32, #tpu.memory_space<vmem>>, %arg6: memref<32x256xbf16, #tpu.memory_space<vmem>>, %arg7: memref<1x32xf32, #tpu.memory_space<vmem>>, %arg8: memref<32x64xbf16, #tpu.memory_space<vmem>>, %arg9: memref<32x32xbf16, #tpu.memory_space<vmem>>, %arg10: memref<8x32xf32, #tpu.memory_space<vmem>>) attributes {dimension_semantics = [#tpu.dimension_semantics<parallel>], iteration_bounds = array<i64: 2>, scalar_prefetch = 0 : i64, scratch_operands = 0 : i64, tpu.core_type = #tpu.core_type<tc>, window_params = [{transform_indices = @transform_0, window_bounds = array<i64: 8, 32>}, {pipeline_mode = #tpu.pipeline_mode<synchronous>, transform_indices = @transform_1, window_bounds = array<i64: 8, 32>}, {pipeline_mode = #tpu.pipeline_mode<synchronous>, transform_indices = @transform_2, window_bounds = array<i64: 8, 32>}, {pipeline_mode = #tpu.pipeline_mode<synchronous>, transform_indices = @transform_3, window_bounds = array<i64: 8, 8>}, {pipeline_mode = #tpu.pipeline_mode<synchronous>, transform_indices = @transform_4, window_bounds = array<i64: 1, 32>}, {pipeline_mode = #tpu.pipeline_mode<synchronous>, transform_indices = @transform_5, window_bounds = array<i64: 32, 256>}, {pipeline_mode = #tpu.pipeline_mode<synchronous>, transform_indices = @transform_6, window_bounds = array<i64: 1, 32>}, {pipeline_mode = #tpu.pipeline_mode<synchronous>, transform_indices = @transform_7, window_bounds = array<i64: 32, 64>}, {pipeline_mode = #tpu.pipeline_mode<synchronous>, transform_indices = @transform_8, window_bounds = array<i64: 32, 32>}, {transform_indices = @transform_9, window_bounds = array<i64: 8, 32>}]} {
    %c0 = arith.constant 0 : index
    %c0_0 = arith.constant 0 : index
    %0 = vector.load %arg1[%c0, %c0_0] : memref<8x32xf32, #tpu.memory_space<vmem>>, vector<8x32xf32>
    %1 = arith.mulf %0, %0 : vector<8x32xf32>
    %cst = arith.constant dense<0.000000e+00> : vector<8xf32>
    %2 = vector.multi_reduction <add>, %1, %cst [1] : vector<8x32xf32> to vector<8xf32>
    %3 = vector.shape_cast %2 : vector<8xf32> to vector<8x1xf32>
    %cst_1 = arith.constant 3.200000e+01 : f32
    %4 = vector.broadcast %cst_1 : f32 to vector<8x1xf32>
    %5 = arith.divf %3, %4 : vector<8x1xf32>
    %cst_2 = arith.constant 9.99999974E-6 : f32
    %6 = vector.broadcast %cst_2 : f32 to vector<8x1xf32>
    %7 = arith.addf %5, %6 : vector<8x1xf32>
    %8 = math.rsqrt %7 : vector<8x1xf32>
    %9 = vector.broadcast %8 : vector<8x1xf32> to vector<8x32xf32>
    %10 = arith.mulf %0, %9 : vector<8x32xf32>
    %c0_3 = arith.constant 0 : index
    %c0_4 = arith.constant 0 : index
    %11 = vector.load %arg5[%c0_3, %c0_4] : memref<1x32xf32, #tpu.memory_space<vmem>>, vector<1x32xf32>
    %12 = vector.broadcast %11 : vector<1x32xf32> to vector<8x32xf32>
    %13 = arith.mulf %10, %12 : vector<8x32xf32>
    %14 = arith.truncf %13 : vector<8x32xf32> to vector<8x32xbf16>
    %c0_5 = arith.constant 0 : index
    %c0_6 = arith.constant 0 : index
    %15 = vector.load %arg6[%c0_5, %c0_6] : memref<32x256xbf16, #tpu.memory_space<vmem>>, vector<32x256xbf16>
    %cst_7 = arith.constant dense<0.000000e+00> : vector<8x256xf32>
    %16 = tpu.matmul %14, %15, %cst_7 {dimension_numbers = #tpu.dot_dimension_numbers<[1], [0], [0], [1], [0, 0, 1, 1], [], []>} : vector<8x32xbf16>, vector<32x256xbf16>, vector<8x256xf32> -> vector<8x256xf32>
    %c0_8 = arith.constant 0 : index
    %c0_9 = arith.constant 0 : index
    %17 = vector.load %arg2[%c0_8, %c0_9] : memref<8x32xf32, #tpu.memory_space<vmem>>, vector<8x32xf32>
    %c0_10 = arith.constant 0 : index
    %c0_11 = arith.constant 0 : index
    %18 = vector.load %arg3[%c0_10, %c0_11] : memref<8x32xf32, #tpu.memory_space<vmem>>, vector<8x32xf32>
    %19 = vector.extract_strided_slice %16 {offsets = [0, 0], sizes = [8, 32], strides = [1, 1]} : vector<8x256xf32> to vector<8x32xf32>
    %20 = arith.mulf %19, %17 : vector<8x32xf32>
    %21 = vector.extract_strided_slice %16 {offsets = [0, 64], sizes = [8, 32], strides = [1, 1]} : vector<8x256xf32> to vector<8x32xf32>
    %22 = arith.mulf %21, %18 : vector<8x32xf32>
    %23 = arith.addf %20, %22 : vector<8x32xf32>
    %24 = vector.extract_strided_slice %16 {offsets = [0, 32], sizes = [8, 32], strides = [1, 1]} : vector<8x256xf32> to vector<8x32xf32>
    %25 = arith.mulf %24, %17 : vector<8x32xf32>
    %26 = vector.extract_strided_slice %16 {offsets = [0, 96], sizes = [8, 32], strides = [1, 1]} : vector<8x256xf32> to vector<8x32xf32>
    %27 = arith.mulf %26, %18 : vector<8x32xf32>
    %28 = arith.addf %25, %27 : vector<8x32xf32>
    %29 = vector.extract_strided_slice %16 {offsets = [0, 128], sizes = [8, 128], strides = [1, 1]} : vector<8x256xf32> to vector<8x128xf32>
    %30 = vector.extract_strided_slice %23 {offsets = [0, 0], sizes = [8, 8], strides = [1, 1]} : vector<8x32xf32> to vector<8x8xf32>
    %31 = vector.extract_strided_slice %23 {offsets = [0, 8], sizes = [8, 8], strides = [1, 1]} : vector<8x32xf32> to vector<8x8xf32>
    %32 = vector.extract_strided_slice %23 {offsets = [0, 16], sizes = [8, 8], strides = [1, 1]} : vector<8x32xf32> to vector<8x8xf32>
    %33 = vector.extract_strided_slice %23 {offsets = [0, 24], sizes = [8, 8], strides = [1, 1]} : vector<8x32xf32> to vector<8x8xf32>
    %34 = vector.shape_cast %30 : vector<8x8xf32> to vector<1x8x8xf32>
    %35 = vector.shape_cast %31 : vector<8x8xf32> to vector<1x8x8xf32>
    %36 = vector.shape_cast %32 : vector<8x8xf32> to vector<1x8x8xf32>
    %37 = vector.shape_cast %33 : vector<8x8xf32> to vector<1x8x8xf32>
    %38 = tpu.concatenate %34, %35, %36, %37 in 0 : vector<1x8x8xf32>, vector<1x8x8xf32>, vector<1x8x8xf32>, vector<1x8x8xf32> -> vector<4x8x8xf32>
    %39 = vector.extract_strided_slice %28 {offsets = [0, 0], sizes = [8, 8], strides = [1, 1]} : vector<8x32xf32> to vector<8x8xf32>
    %40 = vector.extract_strided_slice %28 {offsets = [0, 8], sizes = [8, 8], strides = [1, 1]} : vector<8x32xf32> to vector<8x8xf32>
    %41 = vector.extract_strided_slice %28 {offsets = [0, 16], sizes = [8, 8], strides = [1, 1]} : vector<8x32xf32> to vector<8x8xf32>
    %42 = vector.extract_strided_slice %28 {offsets = [0, 24], sizes = [8, 8], strides = [1, 1]} : vector<8x32xf32> to vector<8x8xf32>
    %43 = vector.shape_cast %39 : vector<8x8xf32> to vector<1x8x8xf32>
    %44 = vector.shape_cast %40 : vector<8x8xf32> to vector<1x8x8xf32>
    %45 = vector.shape_cast %41 : vector<8x8xf32> to vector<1x8x8xf32>
    %46 = vector.shape_cast %42 : vector<8x8xf32> to vector<1x8x8xf32>
    %47 = tpu.concatenate %43, %44, %45, %46 in 0 : vector<1x8x8xf32>, vector<1x8x8xf32>, vector<1x8x8xf32>, vector<1x8x8xf32> -> vector<4x8x8xf32>
    %48 = vector.extract_strided_slice %29 {offsets = [0, 0], sizes = [8, 32], strides = [1, 1]} : vector<8x128xf32> to vector<8x32xf32>
    %49 = vector.extract_strided_slice %29 {offsets = [0, 32], sizes = [8, 32], strides = [1, 1]} : vector<8x128xf32> to vector<8x32xf32>
    %50 = vector.extract_strided_slice %29 {offsets = [0, 64], sizes = [8, 32], strides = [1, 1]} : vector<8x128xf32> to vector<8x32xf32>
    %51 = vector.extract_strided_slice %29 {offsets = [0, 96], sizes = [8, 32], strides = [1, 1]} : vector<8x128xf32> to vector<8x32xf32>
    %52 = vector.shape_cast %48 : vector<8x32xf32> to vector<1x8x32xf32>
    %53 = vector.shape_cast %49 : vector<8x32xf32> to vector<1x8x32xf32>
    %54 = vector.shape_cast %50 : vector<8x32xf32> to vector<1x8x32xf32>
    %55 = vector.shape_cast %51 : vector<8x32xf32> to vector<1x8x32xf32>
    %56 = tpu.concatenate %52, %53, %54, %55 in 0 : vector<1x8x32xf32>, vector<1x8x32xf32>, vector<1x8x32xf32>, vector<1x8x32xf32> -> vector<4x8x32xf32>
    %57 = arith.truncf %38 : vector<4x8x8xf32> to vector<4x8x8xbf16>
    %58 = arith.truncf %47 : vector<4x8x8xf32> to vector<4x8x8xbf16>
    "tpu.trace_start"() <{level = 10 : i32, message = "hqd,hkd->hqk"}> : () -> ()
    %cst_12 = arith.constant dense<0.000000e+00> : vector<4x8x8xf32>
    %59 = tpu.matmul %57, %58, %cst_12 {dimension_numbers = #tpu.dot_dimension_numbers<[2], [2], [1], [1], [0, 0, 0, 1, 1, 1], [0], [0]>} : vector<4x8x8xbf16>, vector<4x8x8xbf16>, vector<4x8x8xf32> -> vector<4x8x8xf32>
    "tpu.trace_stop"() : () -> ()
    %c0_13 = arith.constant 0 : index
    %c0_14 = arith.constant 0 : index
    %60 = vector.load %arg4[%c0_13, %c0_14] : memref<8x8xf32, #tpu.memory_space<vmem>>, vector<8x8xf32>
    %61 = vector.shape_cast %60 : vector<8x8xf32> to vector<1x8x8xf32>
    %62 = vector.broadcast %61 : vector<1x8x8xf32> to vector<4x8x8xf32>
    %63 = arith.addf %59, %62 : vector<4x8x8xf32>
    %cst_15 = arith.constant dense<0xFF800000> : vector<4x8xf32>
    %64 = vector.multi_reduction <maximumf>, %63, %cst_15 [2] : vector<4x8x8xf32> to vector<4x8xf32>
    %65 = vector.shape_cast %64 : vector<4x8xf32> to vector<4x8x1xf32>
    %66 = vector.broadcast %65 : vector<4x8x1xf32> to vector<4x8x8xf32>
    %67 = arith.subf %63, %66 : vector<4x8x8xf32>
    %68 = math.exp %67 : vector<4x8x8xf32>
    %cst_16 = arith.constant dense<0.000000e+00> : vector<4x8xf32>
    %69 = vector.multi_reduction <add>, %68, %cst_16 [2] : vector<4x8x8xf32> to vector<4x8xf32>
    %70 = vector.shape_cast %69 : vector<4x8xf32> to vector<4x8x1xf32>
    %71 = tpu.reciprocal %70 {approx = true} : vector<4x8x1xf32> -> vector<4x8x1xf32>
    %72 = vector.broadcast %71 : vector<4x8x1xf32> to vector<4x8x8xf32>
    %73 = arith.mulf %68, %72 : vector<4x8x8xf32>
    %74 = arith.truncf %73 : vector<4x8x8xf32> to vector<4x8x8xbf16>
    %75 = arith.truncf %56 : vector<4x8x32xf32> to vector<4x8x32xbf16>
    "tpu.trace_start"() <{level = 10 : i32, message = "hqk,hkd->hqd"}> : () -> ()
    %cst_17 = arith.constant dense<0.000000e+00> : vector<4x8x32xf32>
    %76 = tpu.matmul %74, %75, %cst_17 {dimension_numbers = #tpu.dot_dimension_numbers<[2], [1], [1], [2], [0, 0, 0, 1, 1, 2], [0], [0]>} : vector<4x8x8xbf16>, vector<4x8x32xbf16>, vector<4x8x32xf32> -> vector<4x8x32xf32>
    "tpu.trace_stop"() : () -> ()
    %cst_18 = arith.constant dense<0.000000e+00> : vector<8x32xf32>
    %77 = vector.multi_reduction <add>, %76, %cst_18 [0] : vector<4x8x32xf32> to vector<8x32xf32>
    %78 = arith.addf %0, %77 : vector<8x32xf32>
    %79 = arith.mulf %78, %78 : vector<8x32xf32>
    %cst_19 = arith.constant dense<0.000000e+00> : vector<8xf32>
    %80 = vector.multi_reduction <add>, %79, %cst_19 [1] : vector<8x32xf32> to vector<8xf32>
    %81 = vector.shape_cast %80 : vector<8xf32> to vector<8x1xf32>
    %cst_20 = arith.constant 3.200000e+01 : f32
    %82 = vector.broadcast %cst_20 : f32 to vector<8x1xf32>
    %83 = arith.divf %81, %82 : vector<8x1xf32>
    %cst_21 = arith.constant 9.99999974E-6 : f32
    %84 = vector.broadcast %cst_21 : f32 to vector<8x1xf32>
    %85 = arith.addf %83, %84 : vector<8x1xf32>
    %86 = math.rsqrt %85 : vector<8x1xf32>
    %87 = vector.broadcast %86 : vector<8x1xf32> to vector<8x32xf32>
    %88 = arith.mulf %78, %87 : vector<8x32xf32>
    %c0_22 = arith.constant 0 : index
    %c0_23 = arith.constant 0 : index
    %89 = vector.load %arg7[%c0_22, %c0_23] : memref<1x32xf32, #tpu.memory_space<vmem>>, vector<1x32xf32>
    %90 = vector.broadcast %89 : vector<1x32xf32> to vector<8x32xf32>
    %91 = arith.mulf %88, %90 : vector<8x32xf32>
    %92 = arith.truncf %91 : vector<8x32xf32> to vector<8x32xbf16>
    %c0_24 = arith.constant 0 : index
    %c0_25 = arith.constant 0 : index
    %93 = vector.load %arg8[%c0_24, %c0_25] : memref<32x64xbf16, #tpu.memory_space<vmem>>, vector<32x64xbf16>
    %cst_26 = arith.constant dense<0.000000e+00> : vector<8x64xf32>
    %94 = tpu.matmul %92, %93, %cst_26 {dimension_numbers = #tpu.dot_dimension_numbers<[1], [0], [0], [1], [0, 0, 1, 1], [], []>} : vector<8x32xbf16>, vector<32x64xbf16>, vector<8x64xf32> -> vector<8x64xf32>
    %95 = vector.extract_strided_slice %94 {offsets = [0, 0], sizes = [8, 32], strides = [1, 1]} : vector<8x64xf32> to vector<8x32xf32>
    %96 = vector.extract_strided_slice %94 {offsets = [0, 32], sizes = [8, 32], strides = [1, 1]} : vector<8x64xf32> to vector<8x32xf32>
    %97 = arith.negf %95 : vector<8x32xf32>
    %98 = math.exp %97 : vector<8x32xf32>
    %cst_27 = arith.constant 1.000000e+00 : f32
    %99 = vector.broadcast %cst_27 : f32 to vector<8x32xf32>
    %100 = arith.addf %99, %98 : vector<8x32xf32>
    %101 = arith.divf %99, %100 : vector<8x32xf32>
    %102 = arith.mulf %95, %101 : vector<8x32xf32>
    %103 = arith.mulf %102, %96 : vector<8x32xf32>
    %104 = arith.truncf %103 : vector<8x32xf32> to vector<8x32xbf16>
    %c0_28 = arith.constant 0 : index
    %c0_29 = arith.constant 0 : index
    %105 = vector.load %arg9[%c0_28, %c0_29] : memref<32x32xbf16, #tpu.memory_space<vmem>>, vector<32x32xbf16>
    %cst_30 = arith.constant dense<0.000000e+00> : vector<8x32xf32>
    %106 = tpu.matmul %104, %105, %cst_30 {dimension_numbers = #tpu.dot_dimension_numbers<[1], [0], [0], [1], [0, 0, 1, 1], [], []>} : vector<8x32xbf16>, vector<32x32xbf16>, vector<8x32xf32> -> vector<8x32xf32>
    %107 = arith.addf %78, %106 : vector<8x32xf32>
    %c0_31 = arith.constant 0 : index
    %c0_32 = arith.constant 0 : index
    %108 = vector.load %arg10[%c0_31, %c0_32] : memref<8x32xf32, #tpu.memory_space<vmem>>, vector<8x32xf32>
    tpu.vector_store %arg10[%c0_31, %c0_32], %107 {strides = array<i32>} : memref<8x32xf32, #tpu.memory_space<vmem>>, vector<8x32xf32>,
    return
  }
  func.func @transform_0(%arg0: i32) -> (i32, i32) {
    %c0_i32 = arith.constant 0 : i32
    %c0_i32_0 = arith.constant 0 : i32
    return %arg0, %c0_i32 : i32, i32
  }
  func.func @transform_1(%arg0: i32) -> (i32, i32) {
    %c0_i32 = arith.constant 0 : i32
    %c0_i32_0 = arith.constant 0 : i32
    %c0_i32_1 = arith.constant 0 : i32
    return %c0_i32, %c0_i32_0 : i32, i32
  }
  func.func @transform_2(%arg0: i32) -> (i32, i32) {
    %c0_i32 = arith.constant 0 : i32
    %c0_i32_0 = arith.constant 0 : i32
    %c0_i32_1 = arith.constant 0 : i32
    return %c0_i32, %c0_i32_0 : i32, i32
  }
  func.func @transform_3(%arg0: i32) -> (i32, i32) {
    %c0_i32 = arith.constant 0 : i32
    %c0_i32_0 = arith.constant 0 : i32
    %c0_i32_1 = arith.constant 0 : i32
    return %c0_i32, %c0_i32_0 : i32, i32
  }
  func.func @transform_4(%arg0: i32) -> (i32, i32) {
    %c0_i32 = arith.constant 0 : i32
    %c0_i32_0 = arith.constant 0 : i32
    %c0_i32_1 = arith.constant 0 : i32
    return %c0_i32, %c0_i32_0 : i32, i32
  }
  func.func @transform_5(%arg0: i32) -> (i32, i32) {
    %c0_i32 = arith.constant 0 : i32
    %c0_i32_0 = arith.constant 0 : i32
    %c0_i32_1 = arith.constant 0 : i32
    return %c0_i32, %c0_i32_0 : i32, i32
  }
  func.func @transform_6(%arg0: i32) -> (i32, i32) {
    %c0_i32 = arith.constant 0 : i32
    %c0_i32_0 = arith.constant 0 : i32
    %c0_i32_1 = arith.constant 0 : i32
    return %c0_i32, %c0_i32_0 : i32, i32
  }
  func.func @transform_7(%arg0: i32) -> (i32, i32) {
    %c0_i32 = arith.constant 0 : i32
    %c0_i32_0 = arith.constant 0 : i32
    %c0_i32_1 = arith.constant 0 : i32
    return %c0_i32, %c0_i32_0 : i32, i32
  }
  func.func @transform_8(%arg0: i32) -> (i32, i32) {
    %c0_i32 = arith.constant 0 : i32
    %c0_i32_0 = arith.constant 0 : i32
    %c0_i32_1 = arith.constant 0 : i32
    return %c0_i32, %c0_i32_0 : i32, i32
  }
  func.func @transform_9(%arg0: i32) -> (i32, i32) {
    %c0_i32 = arith.constant 0 : i32
    %c0_i32_0 = arith.constant 0 : i32
    return %arg0, %c0_i32 : i32, i32
  }
}

</mosaic_0001>

<bundles_post_ra>
// kernel: tpu_custom_call.1
= control target key start
LH: loop header
LB: loop body
LE: loop exit
PB: predicated region body
PF: predicated region fallthrough
CT: control target
= control target key end

     0   :  { %s2270_s0 = inlined_call_operand.hbm [shape: f32[16,32], index: 0, kind: input, shape index: {}]   ;;  %s2271_s1 = inlined_call_operand.hbm [shape: f32[8,32], index: 1, kind: input, shape index: {}]   ;;  %s2272_s2 = inlined_call_operand.hbm [shape: f32[8,32], index: 2, kind: input, shape index: {}]   ;;  %s2273_s3 = inlined_call_operand.hbm [shape: f32[8,8], index: 3, kind: input, shape index: {}]   ;;  %s2274_s4 = inlined_call_operand.vmem [shape: f32[1,32], index: 4, kind: input, shape index: {}]   ;;  %s2275_s5 = inlined_call_operand.hbm [shape: bf16[32,256], index: 5, kind: input, shape index: {}]   ;;  %s2276_s6 = inlined_call_operand.vmem [shape: f32[1,32], index: 6, kind: input, shape index: {}]   ;;  %s2277_s7 = inlined_call_operand.hbm [shape: bf16[32,64], index: 7, kind: input, shape index: {}]   ;;  %s2278_s8 = inlined_call_operand.hbm [shape: bf16[32,32], index: 8, kind: input, shape index: {}]   ;;  %s2279_s9 = inlined_call_operand.hbm [shape: f32[16,32], index: 9, kind: output, shape index: {}]  }
   0x1   :  { %2284 = sst [smem:[#allocation20_spill]] %s2271_s1 }
   0x2   :  { %2285 = sst [smem:[#allocation21_spill]] %s2272_s2 }
   0x3   :  { %2286 = sst [smem:[#allocation22_spill]] %s2273_s3 }
   0x4   :  { %2287 = sst [smem:[#allocation23_spill]] %s2275_s5 }
   0x5   :  { %14 = vsyncpa [#allocation3], 0 }
   0x6   :  { %16 = vsyncpa [#allocation3 + $0x1], 0 }
   0x7   :  { %17 = vsyncpa [#allocation6], 0 }
   0x8   :  { %18 = vsyncpa [#allocation9], 0 }
   0x9   :  { %19 = vsyncpa [#allocation12], 0 }
   0xa   :  { %20 = vsyncpa [#allocation4], 0 }
   0xb   :  { %22 = vsyncpa [#allocation4 + $0x1], 0  ;;  %s1936_s30 = smov 0   ;;  %s1938_s10 = smov 0  }
   0xc   :  { %s1940_s11 = smov 0   ;;  %s1942_s12 = smov 0  }
   0xd LB: > { %s1865_s13 = smov [#allocation5]   ;;  %s1957_s15 = sadd.s32 4294967295, %s1863_s12   ;;  %s1863_s12 = sphi %s1942_s12, %s2315_s12   ;;  %s1859_s11 = sphi %s1940_s11, %s2314_s11   ;;  %s1855_s10 = sphi %s1938_s10, %s2313_s10   ;;  %s1851_s30 = sphi %s1936_s30, %s2312_s30  }
   0xe   : > { %s266_s14 = sshll.u32 %s1865_s13, 4  ;;  %p1318_p0 = scmp.ge.s32.totalorder %s1863_s12, 1  ;;  %s267_s14 = int_to_ptr.vmem [resolvable:$true] %s266_s14 }
   0xf   : > { %p2280_p1 = scmp.eq.s32.totalorder %s1957_s15, 0  ;;  %p253_p2 = scmp.lt.s32.totalorder %s1863_s12, 3 }
  0x10   : > { %s1866_s17 = smov [#allocation8]   ;;  %s1867_s19 = smov [#allocation11]  }
  0x11   : > { %p1962_p3 = pnand %p1318_p0, %p253_p2  ;;  %s288_s18 = sshll.u32 %s1866_s17, 4  ;;  %s289_s18 = int_to_ptr.vmem [resolvable:$true] %s288_s18 }
  0x12   : > { %s317_s20 = sshll.u32 %s1867_s19, 4  ;;  %s1614_s23 = scalar_lea.vmem %s267_s14, 128  ;;  %s1975_s20 = int_to_ptr.vmem [resolvable:$true] %s317_s20 }
  0x13   : > { %s2288_s16 = scalar_select %p1962_p3, 1, 0 }
  0x14   : > { %p1477_p5 = pneg %p1962_p3  ;;  %p1615_p8 = scmp.ne.s32.totalorder %s267_s14, %s1614_s23 }
  0x15   : > { %p1622_p11 = scmp.lt.s32.totalorder %s267_s14, %s267_s14  ;;  %p1623_p12 = scmp.lt.s32.totalorder %s1614_s23, %s1614_s23 }
  0x16   : > { %p1971_p6 = pnand %p1477_p5, %p2280_p1 }
  0x17   : > { %p1624_p13 = por %p1623_p12, %p1622_p11 }
  0x18   : > { %p1979_p7 = pneg %p1971_p6 }
  0x1a   : > { %p1617_p9 = pnand %p1615_p8, %p1979_p7 }
  0x1c   : > { %p1618_p10 = pneg %p1617_p9 }
  0x1e   : > { %p1625_p0 = pnand %p1624_p13, %p1618_p10 }
  0x20   : > { %1628 = shalt.err (!%p1625_p0)
}
  0x21   : > { %s2291_s1 = sld [smem:[#allocation20_spill]]  ;;  %s1640_s26 = scalar_lea.vmem %s289_s18, 128 }
  0x22   : > { %p1641_p2 = scmp.ne.s32.totalorder %s289_s18, %s1640_s26  ;;  %p1648_p1 = scmp.lt.s32.totalorder %s289_s18, %s289_s18 }
  0x23   : > { %p1649_p8 = scmp.lt.s32.totalorder %s1640_s26, %s1640_s26 }
  0x24   : > { %p1643_p5 = pnand %p1641_p2, %p1979_p7 }
  0x25   : > { %p1650_p9 = por %p1649_p8, %p1648_p1 }
  0x26   : > { %p1644_p4 = pneg %p1643_p5 }
  0x27   : > { %1480 = dma.hbm_to_vmem [thread:$0]  (!%p1971_p6), %s2291_s1, 128, %s267_s14, [#allocation6]  }
  0x28   : > { %p1651_p3 = pnand %p1650_p9, %p1644_p4 }
  0x2a   : > { %1654 = shalt.err (!%p1651_p3)
}
  0x2b   : > { %s2292_s3 = sld [smem:[#allocation22_spill]]  ;;  %s1666_s29 = scalar_lea.vmem %s1975_s20, 256 }
  0x2c   : > { %p1667_p10 = scmp.ne.s32.totalorder %s1975_s20, %s1666_s29  ;;  %p1674_p13 = scmp.lt.s32.totalorder %s1975_s20, %s1975_s20 }
  0x2d   : > { %p1675_p1 = scmp.lt.s32.totalorder %s1666_s29, %s1666_s29 }
  0x2e   : > { %p1669_p11 = pnand %p1667_p10, %p1979_p7 }
  0x2f   : > { %p1676_p4 = por %p1675_p1, %p1674_p13 }
  0x30   : > { %p1670_p12 = pneg %p1669_p11 }
  0x31   : > { %1486 = dma.hbm_to_vmem [thread:$0]  (!%p1971_p6), %s2292_s3, 128, %s289_s18, [#allocation9]  }
  0x32   : > { %p1677_p3 = pnand %p1676_p4, %p1670_p12 }
  0x34   : > { %1680 = shalt.err (!%p1677_p3)
}
  0x35   : > { %s1868_s13 = smov 64   ;;  %s1869_s14 = smov 4  }
  0x36   : > { %1492 = dma.hbm_to_vmem [thread:$0]  (!%p1971_p6), %s2277_s7, 256, %s1975_s20, [#allocation12], %s1868_s13, %s1868_s13, %s1869_s14  }
  0x37   : > { %s1870_s19 = smov [#allocation7]   ;;  %s1871_s24 = smov [#allocation10]  }
  0x38   : > { %s277_s23 = sshll.u32 %s1870_s19, 4  ;;  %s301_s25 = sshll.u32 %s1871_s24, 4  ;;  %s278_s23 = int_to_ptr.vmem [resolvable:$true] %s277_s23  ;;  %s302_s25 = int_to_ptr.vmem [resolvable:$true] %s301_s25 }
  0x39   : > { %s1692_s26 = scalar_lea.vmem %s278_s23, 128  ;;  %p1700_p8 = scmp.lt.s32.totalorder %s278_s23, %s278_s23 }
  0x3a   : > { %p1693_p0 = scmp.ne.s32.totalorder %s278_s23, %s1692_s26  ;;  %p1701_p9 = scmp.lt.s32.totalorder %s1692_s26, %s1692_s26 }
  0x3c   : > { %p1695_p2 = pnand %p1693_p0, %p1979_p7  ;;  %p1702_p10 = por %p1701_p9, %p1700_p8 }
  0x3e   : > { %p1696_p5 = pneg %p1695_p2 }
  0x40   : > { %p1703_p11 = pnand %p1702_p10, %p1696_p5 }
  0x42   : > { %1706 = shalt.err (!%p1703_p11)
}
  0x43   : > { %s2293_s2 = sld [smem:[#allocation21_spill]]  ;;  %s1718_s20 = scalar_lea.vmem %s302_s25, 512 }
  0x44   : > { %p1719_p12 = scmp.ne.s32.totalorder %s302_s25, %s1718_s20  ;;  %p1726_p4 = scmp.lt.s32.totalorder %s302_s25, %s302_s25 }
  0x45   : > { %p1727_p3 = scmp.lt.s32.totalorder %s1718_s20, %s1718_s20 }
  0x46   : > { %p1721_p13 = pnand %p1719_p12, %p1979_p7 }
  0x47   : > { %p1728_p0 = por %p1727_p3, %p1726_p4 }
  0x48   : > { %p1722_p1 = pneg %p1721_p13 }
  0x49   : > { %1483 = dma.hbm_to_vmem [thread:$0]  (!%p1971_p6), %s2293_s2, 128, %s278_s23, [#allocation6]  }
  0x4a   : > { %p1729_p2 = pnand %p1728_p0, %p1722_p1 }
  0x4c   : > { %1732 = shalt.err (!%p1729_p2)
}
  0x4d   : > { %s1872_s29 = smov 128   ;;  %s1873_s17 = smov 8  }
  0x4e   : > { %s2294_s5 = sld [smem:[#allocation23_spill]]  ;;  %s1874_s23 = smov [#allocation13]  }
  0x4f   : > { %s330_s24 = sshll.u32 %s1874_s23, 4  ;;  %s331_s24 = int_to_ptr.vmem [resolvable:$true] %s330_s24 }
  0x50   : > { %s1744_s26 = scalar_lea.vmem %s331_s24, 256  ;;  %p1752_p10 = scmp.lt.s32.totalorder %s331_s24, %s331_s24 }
  0x51   : > { %p1745_p5 = scmp.ne.s32.totalorder %s331_s24, %s1744_s26  ;;  %p1753_p11 = scmp.lt.s32.totalorder %s1744_s26, %s1744_s26 }
  0x53   : > { %p1747_p8 = pnand %p1745_p5, %p1979_p7  ;;  %p1754_p12 = por %p1753_p11, %p1752_p10 }
  0x54   : > { %1489 = dma.hbm_to_vmem [thread:$0]  (!%p1971_p6), %s2294_s5, 512, %s302_s25, [#allocation9], %s1872_s29, %s1872_s29, %s1873_s17  }
  0x55   : > { %p1748_p9 = pneg %p1747_p8 }
  0x57   : > { %p1755_p13 = pnand %p1754_p12, %p1748_p9 }
  0x59   : > { %1758 = shalt.err (!%p1755_p13)
}
  0x5a   : > { %1495 = dma.hbm_to_vmem [thread:$0]  (!%p1971_p6), %s2278_s8, 256, %s331_s24, [#allocation12], %s1868_s13, %s1868_s13, %s1869_s14  }
  0x5b   : > { %s1317_s21 = sadd.s32 4294967294, %s1863_s12   ;;  %s2038_s22 = sadd.s32 1, %s1863_s12  }
  0x5c   : > { %s32_s28 = ssub.s32 %s1863_s12, %s2038_s22  ;;  %s35_s20 = sadd.s32 1, %s1859_s11 }
  0x5d   : > { %p33_p7 = scmp.eq.s32.totalorder %s32_s28, 0  ;;  %p42_p1 = scmp.ne.s32.totalorder %s1859_s11, %s1855_s10 }
  0x5e   : > { %p43_p4 = scmp.eq.s32.totalorder %s1863_s12, 0  ;;  %p48_p3 = scmp.ne.s32.totalorder %s1855_s10, %s1851_s30 }
  0x5f   : > { %s2049_s29 = scalar_select %p33_p7, %s1859_s11, %s35_s20  }
  0x60   : > { %p2051_p0 = por %p43_p4, %p42_p1  ;;  %p2296_p2 = scmp.eq.s32.totalorder %s1957_s15, 0 }
  0x61   : > { %p240_p5 = scmp.eq.s32.totalorder %s1957_s15, 1  ;;  %p246_p8 = scmp.eq.s32.totalorder %s1317_s21, 1 }
  0x62   : > { %p2057_p6 = por %p2296_p2, %p48_p3  ;;  %p1510_p9 = scmp.lt.s32.totalorder %s1863_s12, 2 }
  0x63   : > { %s344_s14 = sand.u32 1, %s1859_s11   ;;  %p2064_p10 = por %p240_p5, %p42_p1 }
  0x64   : > { %s2297_s13 = scalar_select %p2057_p6, 1, 0 }
  0x65   : > { %s2298_s18 = scalar_select %p2064_p10, 1, 0 }
  0x66   : > { %p2068_p11 = por %p246_p8, %p48_p3  ;;  %s1326_s23 = sshll.u32 %s344_s14, 3 }
  0x67   : > { %s1327_s24 = sshll.u32 %s1863_s12, 7  ;;  %s348_s21 = scalar_lea.vmem [#allocation2], %s1326_s23 }
  0x68   : > { %s2299_s19 = scalar_select %p2068_p11, 1, 0 }
  0x69   : > { %s2076_s25 = scalar_lea.hbm %s2270_s0, %s1327_s24  ;;  %s355_s28 = sshll.u32 %s348_s21, 4  ;;  %s356_s28 = int_to_ptr.vmem [resolvable:$true] %s355_s28 }
  0x6a   : > { %p2080_p12 = pnand %p1510_p9, %p2051_p0  ;;  %s345_s1 = scalar_lea.sflag [#allocation3], %s344_s14 }
  0x6b   : > { %s1759_s2 = scalar_lea.hbm %s2076_s25, 128  ;;  %s1764_s27 = scalar_lea.hbm %s2270_s0, 256 }
  0x6c   : > { %p1760_p13 = scmp.ne.s32.totalorder %s2076_s25, %s1759_s2  ;;  %p1761_p7 = pneg %p2080_p12 }
  0x6d   : > { %p1765_p3 = scmp.lt.s32.totalorder %s2076_s25, %s2270_s0  ;;  %p1766_p0 = scmp.lt.s32.totalorder %s1764_s27, %s1759_s2 }
  0x6e   : > { %p1762_p1 = pnand %p1761_p7, %p1760_p13 }
  0x6f   : > { %p1767_p2 = por %p1766_p0, %p1765_p3 }
  0x70   : > { %p1763_p4 = pneg %p1762_p1 }
  0x72   : > { %p1768_p5 = pnand %p1767_p2, %p1763_p4 }
  0x74   : > { %1771 = shalt.err (!%p1768_p5)
}
  0x75   : > { %s1772_s17 = scalar_lea.vmem %s356_s28, 128  ;;  %s1875_s14 = smov [#allocation2]  }
  0x76   : > { %p1773_p8 = scmp.ne.s32.totalorder %s356_s28, %s1772_s17  ;;  %s1777_s3 = sshll.u32 %s1875_s14, 4  ;;  %s1778_s3 = int_to_ptr.vmem [resolvable:$false] %s1777_s3 }
  0x77   : > { %s1779_s5 = scalar_lea.vmem %s1778_s3, 256  ;;  %p1780_p13 = scmp.lt.s32.totalorder %s356_s28, %s1778_s3 }
  0x78   : > { %p1775_p9 = pnand %p1773_p8, %p1761_p7  ;;  %p1781_p1 = scmp.lt.s32.totalorder %s1779_s5, %s1772_s17 }
  0x7a   : > { %p1776_p11 = pneg %p1775_p9  ;;  %p1782_p10 = por %p1781_p1, %p1780_p13 }
  0x7c   : > { %p1783_p6 = pnand %p1782_p10, %p1776_p11 }
  0x7e   : > { %1786 = shalt.err (!%p1783_p6)
}
  0x7f   : > { %1499 = dma.hbm_to_vmem [thread:$0]  (!%p2080_p12), %s2076_s25, 128, %s356_s28, %s345_s1  }
  0x80   : > { %p2301_p4 = scmp.ne.s32.totalorder %s2288_s16, 0 }
  0x81   : > { %s2101_s2 = sand.u32 (!%p2301_p4), 1, %s1855_s10   ;;  %p2302_p10 = scmp.ne.s32.totalorder (!%p2301_p4), %s2297_s13, 0 }
  0x82   : > { %364 = sbr.rel (%p2301_p4) target bundleno = 2317 (0x90d), region = 56  ;;  %s1329_s24 = sshll.u32 (!%p2301_p4), %s2101_s2, 3 }
  0x83   : > { %s367_s3 = scalar_lea.sflag (!%p2301_p4), [#allocation3], %s2101_s2  ;;  %s370_s5 = scalar_lea.vmem (!%p2301_p4), [#allocation2], %s1329_s24 }
  0x87   : > { %1830 = dma.done.wait (%p2302_p10), %s367_s3, 128  }
  0x88   : > { %1832 = vsyncadd (%p2302_p10), %s367_s3, 4294967168  ;;  %p2303_p6 = scmp.eq.s32.totalorder %s1957_s15, 0 }
  0x8a   : > { %1834 = dma.done.wait (%p2303_p6), [#allocation6], 256   ;;  %p2304_p11 = pmov %p2303_p6 }
  0x8b   : > { %p2305_p12 = pmov %p2303_p6 }
  0x8c   : > { %1836 = vsyncadd (%p2304_p11), [#allocation6], 4294967040 }
  0x8d   : > { %1838 = dma.done.wait (%p2305_p12), [#allocation9], 640   ;;  %p2306_p7 = pmov %p2303_p6 }
  0x8e   : > { %p2307_p3 = pmov %p2303_p6 }
  0x8f   : > { %1840 = vsyncadd (%p2306_p7), [#allocation9], 4294966656 }
  0x90   : > { %1842 = dma.done.wait (%p2307_p3), [#allocation12], 512   ;;  %p2308_p0 = pmov %p2307_p3 }
  0x91   : > { %v2123_v0 = vld [vmem:[%s370_s5] sm:$0xff]  ;;  %vm432_vm0 = vcmask 261120   ;;  %v1876_v6 = vmov 0   ;;  %v518_v8 = vld [vmem:[#allocation5] sm:$0xff]  ;;  %v519_v9 = vld [vmem:[#allocation7] sm:$0xff]  ;;  %s1877_s1 = smov 32  }
  0x92   : > { %1844 = vsyncadd (%p2308_p0), [#allocation12], 4294966784  ;;  %v431_v1 = vmul.f32 %v2123_v0, %v2123_v0  ;;  %v1569_v3 = vld [vmem:[#allocation10 + $0x14] ss:$8 sps:$4 sm:$0xff]   ;;  %v1571_v4 = vld [vmem:[#allocation10 + $0x10] ss:$8 sps:$4 sm:$0xff]   ;;  %509 = vmatprep.mubr.bf16.mxu0 %v1876_v6  ;;  %532 = vrot.lane.b32.xlu1 %v518_v8, %s1877_s1 }
  0x93   : > { %v1572_v5 = vld [vmem:[#allocation10 + $0x4] ss:$8 sps:$4 sm:$0xff]   ;;  %489 = vmatprep.subr.bf16.mxu0 %v1569_v3  ;;  %v1574_v7 = vld [vmem:[#allocation10] ss:$8 sps:$4 sm:$0xff]   ;;  %s1878_s16 = smov 96   ;;  %s1879_s28 = smov 64  }
  0x94   : > { %v433_v2 = vsel %vm432_vm0, %v431_v1, 0.0  ;;  %490 = vmatpush1.bf16.msra.mxu0 %v1571_v4  ;;  %v1337_v14 = vld [vmem:[%s2274_s4] ss:$0 sm:$0xff]  ;;  %v1880_v24 = vmov 0.0   ;;  %vm1881_vm1 = vmmov 0   ;;  %s1882_s20 = smov 120  }
  0x95   : > { %434 = vadd.xlane.f32.xlu0 %v433_v2  ;;  %491 = vmatprep.subr.bf16.mxu0 %v1572_v5  ;;  %s1883_s26 = smov 112   ;;  %s1884_s27 = smov 104   ;;  %vm587_vm2 = vcmask 64512   ;;  %vm836_vm3 = vcmask 1043456   ;;  %v583_v58 = vld [vmem:[#allocation8] sm:$0xff] }
  0x96   : > { %1385 = vmatprep.subr.bf16.mxu1 %v1880_v24  ;;  %1387 = vmatprep.mubr.msk.bf16.mxu1 %vm1881_vm1, %v1880_v24  ;;  %s1360_s17 = sshll.u32 %s1957_s15, 7  ;;  %s428_s14 = scalar_lea.vmem [#allocation14], %s1329_s24 }
  0x97   : > { %s1190_s3 = sshll.u32 %s428_s14, 4  ;;  %s1177_s15 = scalar_lea.sflag [#allocation4], %s2101_s2  ;;  %s2228_s3 = int_to_ptr.vmem [resolvable:$true] %s1190_s3 }
  0x98   : > { %492 = vmatpush1.bf16.msra.mxu0 %v1574_v7  ;;  %s1787_s13 = scalar_lea.vmem %s2228_s3, 128  ;;  %p2309_p5 = scmp.ne.s32.totalorder %s2298_s18, 0 }
  0x99   : > { %1391 = vmatprep.subr.bf16.mxu0 %v1880_v24  ;;  %p1788_p2 = scmp.ne.s32.totalorder %s2228_s3, %s1787_s13  ;;  %s1885_s24 = smov [#allocation14]  }
  0x9a   : > { %s1791_s25 = sshll.u32 %s1885_s24, 4  ;;  %s1792_s25 = int_to_ptr.vmem [resolvable:$false] %s1791_s25 }
  0x9b   : > { %p1789_p8 = pnand %p1788_p2, %p2309_p5  ;;  %p1794_p13 = scmp.lt.s32.totalorder %s2228_s3, %s1792_s25 }
  0x9d   : > { %p1790_p9 = pneg %p1789_p8 }
  0xab   : > { %536 = vrot.lane.b32.xlu0 %v519_v9, %s1878_s16 }
 0x104   : > { %v533_v25 = vpop.permute.xlu1 %532 }
 0x11e   : > { %v435_v10 = vpop.xlane.xlu0 %434 }
 0x11f   : > { %v437_v11 = vmul.f32 0.03125, %v435_v10 }
 0x121   : > { %v438_v12 = vadd.f32 1e-05, %v437_v11 }
 0x122   : > { %v537_v18 = vpop.permute.xlu0 %536 }
 0x123   : > { %1579 = vrsqrt.f32 %v438_v12 }
 0x130   : > { %v1580_v13 = vpop.eup %1579 }
 0x131   : > { %v440_v15 = vmul.f32 %v1580_v13, %v2123_v0 }
 0x133   : > { %v448_v16 = vmul.f32 %v1337_v14, %v440_v15 }
 0x135   : > { %v449_v17 = vpack.c.bf16 %v448_v16, %v448_v16 }
 0x137   : > { %1342 = vmatmul.mubr.msk.bf16.vlgmr.msra.gmra.mxu0 %vm432_vm0, %v449_v17 }
 0x138   : > { %1393 = vmatprep.mubr.msk.bf16.mxu0 %vm1881_vm1, %v1880_v24 }
 0x1f7   : > { %v511_v19 = vpop.f32.mrf.mxu0 }
 0x1f8   : > { %v539_v20 = vmul.f32 %v537_v18, %v511_v19  ;;  %v535_v26 = vmul.f32 %v533_v25, %v511_v19  ;;  %v520_v34 = vmul.f32 %v518_v8, %v511_v19 }
 0x1f9   : > { %v2135_v21 = vpop.f32.mrf.mxu0 }
 0x1fa   : > { %541 = vrot.lane.b32.xlu1 %v539_v20, %s1879_s28  ;;  %v829_v53 = vpack.c.bf16 %v2135_v21, %v2135_v21 }
 0x1fb   : > { %v515_v22 = vpop.f32.mrf.mxu0 }
 0x1fc   : > { %v838_v56 = vsel %vm836_vm3, %v829_v53, 0 }
 0x1fd   : > { %v516_v23 = vpop.f32.mrf.mxu0 }
 0x1fe   : > { %522 = vrot.lane.b32.xlu1 %v519_v9, %s1879_s28 }
 0x26c   : > { %v542_v27 = vpop.permute.xlu1 %541 }
 0x26d   : > { %v544_v28 = vadd.f32 %v542_v27, %v535_v26 }
 0x26f   : > { %v579_v29 = vpack.c.bf16 %v544_v28, %v544_v28 }
 0x270   : > { %v523_v30 = vpop.permute.xlu1 %522 }
 0x271   : > { %v525_v31 = vmul.f32 %v523_v30, %v511_v19  ;;  %585 = vrot.lane.b32.xlu0 %v579_v29, %s1878_s16 }
 0x273   : > { %527 = vrot.lane.b32.xlu1 %v525_v31, %s1879_s28 }
 0x277   : > { %556 = vrot.lane.b32.xlu1 %v544_v28, %s1882_s20 }
 0x27b   : > { %559 = vrot.lane.b32.xlu1 %v544_v28, %s1883_s26 }
 0x27f   : > { %562 = vrot.lane.b32.xlu1 %v544_v28, %s1884_s27 }
 0x2e3   : > { %v586_v32 = vpop.permute.xlu0 %585 }
 0x2e4   : > { %v592_v33 = vsel %vm587_vm2, %v586_v32, 0 }
 0x2e5   : > { %1386 = vmatpush3.bf16.xpose.msra.mxu1 %v592_v33  ;;  %v528_v35 = vpop.permute.xlu1 %527 }
 0x2e6   : > { %v530_v36 = vadd.f32 %v528_v35, %v520_v34  ;;  %1397 = vmatprep.subr.bf16.mxu1 %v1880_v24 }
 0x2e8   : > { %546 = vrot.lane.b32.xlu0 %v530_v36, %s1882_s20  ;;  %v575_v39 = vpack.c.bf16 %v530_v36, %v530_v36 }
 0x2e9   : > { %v557_v37 = vpop.permute.xlu1 %556 }
 0x2ea   : > { %v580_v38 = vpack.c.bf16 %v557_v37, %v557_v37 }
 0x2ec   : > { %1388 = vmatmul.mubr.msk.bf16.vlgmr.msra.gmra.mxu1 %vm587_vm2, %v575_v39  ;;  %635 = vrot.lane.b32.xlu1 %v580_v38, %s1878_s16 }
 0x2ed   : > { %v560_v40 = vpop.permute.xlu1 %559  ;;  %1399 = vmatprep.mubr.msk.bf16.mxu1 %vm1881_vm1, %v1880_v24 }
 0x2ee   : > { %v581_v41 = vpack.c.bf16 %v560_v40, %v560_v40 }
 0x2f0   : > { %684 = vrot.lane.b32.xlu1 %v581_v41, %s1878_s16 }
 0x2f1   : > { %v563_v42 = vpop.permute.xlu1 %562 }
 0x2f2   : > { %v582_v43 = vpack.c.bf16 %v563_v42, %v563_v42 }
 0x2f4   : > { %549 = vrot.lane.b32.xlu1 %v530_v36, %s1883_s26  ;;  %733 = vrot.lane.b32.xlu0 %v582_v43, %s1878_s16 }
 0x2f8   : > { %552 = vrot.lane.b32.xlu0 %v530_v36, %s1884_s27 }
 0x35a   : > { %v547_v46 = vpop.permute.xlu0 %546 }
 0x35b   : > { %v576_v49 = vpack.c.bf16 %v547_v46, %v547_v46 }
 0x35e   : > { %v636_v44 = vpop.permute.xlu1 %635 }
 0x35f   : > { %v641_v45 = vsel %vm587_vm2, %v636_v44, 0 }
 0x360   : > { %1392 = vmatpush3.bf16.xpose.msra.mxu0 %v641_v45 }
 0x361   : > { %1403 = vmatprep.subr.bf16.mxu0 %v1880_v24 }
 0x362   : > { %v685_v47 = vpop.permute.xlu1 %684 }
 0x363   : > { %v690_v48 = vsel %vm587_vm2, %v685_v47, 0 }
 0x364   : > { %1398 = vmatpush3.bf16.xpose.msra.mxu1 %v690_v48 }
 0x365   : > { %1409 = vmatprep.subr.bf16.mxu1 %v1880_v24 }
 0x366   : > { %v734_v50 = vpop.permute.xlu0 %733  ;;  %v550_v51 = vpop.permute.xlu1 %549 }
 0x367   : > { %v739_v52 = vsel %vm587_vm2, %v734_v50, 0  ;;  %1394 = vmatmul.mubr.msk.bf16.vlgmr.msra.gmra.mxu0 %vm587_vm2, %v576_v49  ;;  %v577_v54 = vpack.c.bf16 %v550_v51, %v550_v51 }
 0x368   : > { %1404 = vmatpush3.bf16.xpose.msra.mxu0 %v739_v52  ;;  %1405 = vmatprep.mubr.msk.bf16.mxu0 %vm1881_vm1, %v1880_v24 }
 0x369   : > { %1415 = vmatprep.subr.bf16.mxu0 %v1880_v24 }
 0x36a   : > { %v553_v55 = vpop.permute.xlu0 %552 }
 0x36b   : > { %1400 = vmatmul.mubr.msk.bf16.vlgmr.msra.gmra.mxu1 %vm587_vm2, %v577_v54  ;;  %v578_v57 = vpack.c.bf16 %v553_v55, %v553_v55 }
 0x36c   : > { %1410 = vmatpush3.bf16.msra.mxu1 %v838_v56  ;;  %1411 = vmatprep.mubr.msk.bf16.mxu1 %vm1881_vm1, %v1880_v24 }
 0x36d   : > { %1421 = vmatprep.subr.bf16.mxu1 %v1880_v24 }
 0x36f   : > { %1406 = vmatmul.mubr.msk.bf16.vlgmr.msra.gmra.mxu0 %vm587_vm2, %v578_v57 }
 0x370   : > { %1417 = vmatprep.mubr.msk.bf16.mxu0 %vm1881_vm1, %v1880_v24 }
 0x3ac   : > { %v628_v59 = vpop.f32.mrf.mxu1 }
 0x3ad   : > { %v629_v60 = vadd.f32 %v628_v59, %v583_v58 }
 0x3ae   : > { %v1389_v61 = vpop.f32.mrf.mxu1 }
 0x3af   : > { %v781_v62 = vsel %vm587_vm2, %v629_v60, -inf }
 0x3b0   : > { %v631_v63 = vpop.f32.mrf.mxu1  ;;  %782 = vmax.xlane.f32.xlu1 %v781_v62 }
 0x3b2   : > { %v1390_v1 = vpop.f32.mrf.mxu1 }
 0x427   : > { %v677_v2 = vpop.f32.mrf.mxu0 }
 0x428   : > { %v678_v3 = vadd.f32 %v677_v2, %v583_v58 }
 0x429   : > { %v1395_v4 = vpop.f32.mrf.mxu0 }
 0x42a   : > { %v784_v5 = vsel %vm587_vm2, %v678_v3, -inf }
 0x42b   : > { %785 = vmax.xlane.f32.xlu0 %v784_v5  ;;  %v680_v6 = vpop.f32.mrf.mxu0  ;;  %v726_v7 = vpop.f32.mrf.mxu1 }
 0x42c   : > { %v727_v8 = vadd.f32 %v726_v7, %v583_v58 }
 0x42d   : > { %v1396_v9 = vpop.f32.mrf.mxu0  ;;  %v1401_v10 = vpop.f32.mrf.mxu1 }
 0x42e   : > { %v787_v11 = vsel %vm587_vm2, %v727_v8, -inf }
 0x42f   : > { %v775_v12 = vpop.f32.mrf.mxu0  ;;  %788 = vmax.xlane.f32.xlu0 %v787_v11  ;;  %v729_v13 = vpop.f32.mrf.mxu1 }
 0x430   : > { %v776_v14 = vadd.f32 %v775_v12, %v583_v58 }
 0x431   : > { %v1402_v15 = vpop.f32.mrf.mxu1  ;;  %v1407_v16 = vpop.f32.mrf.mxu0 }
 0x432   : > { %v790_v17 = vsel %vm587_vm2, %v776_v14, -inf }
 0x433   : > { %791 = vmax.xlane.f32.xlu1 %v790_v17  ;;  %v778_v18 = vpop.f32.mrf.mxu0 }
 0x435   : > { %v1408_v19 = vpop.f32.mrf.mxu0 }
 0x439   : > { %v783_v20 = vpop.xlane.xlu1 %782 }
 0x43a   : > { %v793_v22 = vsub.f32 %v629_v60, %v783_v20 }
 0x43c   : > { %v797_v23 = vmul.f32 1.442695, %v793_v22 }
 0x43e   : > { %1581 = vpow2.f32 %v797_v23 }
 0x44b   : > { %v1582_v25 = vpop.eup %1581 }
 0x44c   : > { %v805_v26 = vsel %vm587_vm2, %v1582_v25, 0.0 }
 0x44d   : > { %806 = vadd.xlane.f32.xlu0 %v805_v26 }
 0x4b4   : > { %v786_v27 = vpop.xlane.xlu0 %785 }
 0x4b5   : > { %v794_v28 = vsub.f32 %v678_v3, %v786_v27 }
 0x4b7   : > { %v799_v29 = vmul.f32 1.442695, %v794_v28 }
 0x4b8   : > { %v789_v30 = vpop.xlane.xlu0 %788 }
 0x4b9   : > { %1583 = vpow2.f32 %v799_v29  ;;  %v795_v31 = vsub.f32 %v727_v8, %v789_v30 }
 0x4bb   : > { %v801_v32 = vmul.f32 1.442695, %v795_v31  ;;  %v1575_v31 = vld [vmem:[#allocation11 + $0x8] sm:$0xff]  }
 0x4bc   : > { %v792_v38 = vpop.xlane.xlu1 %791 }
 0x4bd   : > { %1585 = vpow2.f32 %v801_v32  ;;  %v796_v40 = vsub.f32 %v776_v14, %v792_v38  ;;  %v1576_v32 = vld [vmem:[#allocation11] sm:$0xff]  }
 0x4bf   : > { %v803_v43 = vmul.f32 1.442695, %v796_v40  ;;  %v1577_v40 = vld [vmem:[#allocation13 + $0x8] sm:$0xff]  }
 0x4c6   : > { %v1584_v33 = vpop.eup %1583 }
 0x4c7   : > { %v808_v34 = vsel %vm587_vm2, %v1584_v33, 0.0 }
 0x4c8   : > { %809 = vadd.xlane.f32.xlu1 %v808_v34 }
 0x4ca   : > { %v1586_v35 = vpop.eup %1585 }
 0x4cb   : > { %v811_v36 = vsel %vm587_vm2, %v1586_v35, 0.0 }
 0x4cc   : > { %812 = vadd.xlane.f32.xlu0 %v811_v36 }
 0x4d6   : > { %v807_v37 = vpop.xlane.xlu0 %806 }
 0x4d7   : > { %1587 = vrcp.f32 %v807_v37 }
 0x4d8   : > { %1589 = vpow2.f32 %v803_v43 }
 0x4d9   : > { %569 = vrot.lane.b32.xlu1 %v2135_v21, %s1879_s28  ;;  %s1793_s28 = scalar_lea.vmem %s1792_s25, 256 }
 0x4da   : > { %p1795_p1 = scmp.lt.s32.totalorder %s1793_s28, %s1787_s13 }
 0x4dc   : > { %p1796_p4 = por %p1795_p1, %p1794_p13 }
 0x4de   : > { %p1797_p10 = pnand %p1796_p4, %p1790_p9 }
 0x4e2   : > { %566 = vrot.lane.b32.xlu0 %v2135_v21, %s1878_s16 }
 0x4e4   : > { %v1588_v39 = vpop.eup %1587 }
 0x4e5   : > { %v821_v41 = vmul.f32 %v1588_v39, %v1582_v25  ;;  %v1590_v44 = vpop.eup %1589 }
 0x4e6   : > { %v814_v45 = vsel %vm587_vm2, %v1590_v44, 0.0 }
 0x4e7   : > { %v825_v42 = vpack.c.bf16 %v821_v41, %v821_v41  ;;  %v1578_v41 = vld [vmem:[#allocation13] sm:$0xff]  }
 0x4e9   : > { %1412 = vmatmul.mubr.msk.bf16.vlgmr.msra.gmra.mxu1 %vm587_vm2, %v825_v42 }
 0x4ea   : > { %1423 = vmatprep.mubr.msk.bf16.mxu1 %vm1881_vm1, %v1880_v24 }
 0x4fd   : > { %815 = vadd.xlane.f32.xlu1 %v814_v45 }
 0x50e   : > { %572 = vrot.lane.b32.xlu1 %v2135_v21, %s1877_s1 }
 0x551   : > { %v810_v46 = vpop.xlane.xlu1 %809 }
 0x552   : > { %1591 = vrcp.f32 %v810_v46 }
 0x555   : > { %v813_v47 = vpop.xlane.xlu0 %812  ;;  %v570_v48 = vpop.permute.xlu1 %569 }
 0x556   : > { %1593 = vrcp.f32 %v813_v47  ;;  %v831_v49 = vpack.c.bf16 %v570_v48, %v570_v48 }
 0x558   : > { %v930_v50 = vsel %vm836_vm3, %v831_v49, 0 }
 0x559   : > { %v567_v51 = vpop.permute.xlu0 %566  ;;  %1422 = vmatpush3.bf16.msra.mxu1 %v930_v50 }
 0x55a   : > { %v830_v52 = vpack.c.bf16 %v567_v51, %v567_v51  ;;  %1433 = vmatprep.subr.bf16.mxu1 %v1880_v24 }
 0x55c   : > { %v884_v53 = vsel %vm836_vm3, %v830_v52, 0 }
 0x55d   : > { %1416 = vmatpush3.bf16.msra.mxu0 %v884_v53 }
 0x55e   : > { %1427 = vmatprep.subr.bf16.mxu0 %v1880_v24 }
 0x55f   : > { %v1592_v54 = vpop.eup %1591 }
 0x560   : > { %v822_v21 = vmul.f32 %v1592_v54, %v1584_v33 }
 0x562   : > { %v826_v55 = vpack.c.bf16 %v822_v21, %v822_v21 }
 0x563   : > { %v1594_v56 = vpop.eup %1593 }
 0x564   : > { %1418 = vmatmul.mubr.msk.bf16.vlgmr.msra.gmra.mxu0 %vm587_vm2, %v826_v55  ;;  %v823_v57 = vmul.f32 %v1594_v56, %v1586_v35 }
 0x565   : > { %1429 = vmatprep.mubr.msk.bf16.mxu0 %vm1881_vm1, %v1880_v24 }
 0x566   : > { %v827_v58 = vpack.c.bf16 %v823_v57, %v823_v57 }
 0x568   : > { %1424 = vmatmul.mubr.msk.bf16.vlgmr.msra.gmra.mxu1 %vm587_vm2, %v827_v58 }
 0x569   : > { %1437 = vmatprep.mubr.msk.bf16.mxu1 %vm1881_vm1, %v1880_v24  ;;  %1434 = vmatpush3.bf16.msra.mxu1 %v1575_v31 }
 0x56a   : > { %1435 = vmatprep.subr.bf16.mxu1 %v1880_v24 }
 0x56d   : > { %1436 = vmatpush3.bf16.msra.mxu1 %v1576_v32 }
 0x586   : > { %v816_v59 = vpop.xlane.xlu1 %815 }
 0x587   : > { %1595 = vrcp.f32 %v816_v59 }
 0x58a   : > { %v573_v60 = vpop.permute.xlu1 %572 }
 0x58b   : > { %v832_v61 = vpack.c.bf16 %v573_v60, %v573_v60 }
 0x58d   : > { %v976_v62 = vsel %vm836_vm3, %v832_v61, 0 }
 0x58e   : > { %1428 = vmatpush3.bf16.msra.mxu0 %v976_v62 }
 0x58f   : > { %1441 = vmatprep.subr.bf16.mxu0 %v1880_v24 }
 0x594   : > { %v1596_v63 = vpop.eup %1595 }
 0x595   : > { %v824_v1 = vmul.f32 %v1596_v63, %v1590_v44 }
 0x597   : > { %v828_v2 = vpack.c.bf16 %v824_v1, %v824_v1 }
 0x599   : > { %1430 = vmatmul.mubr.msk.bf16.vlgmr.msra.gmra.mxu0 %vm587_vm2, %v828_v2 }
 0x59a   : > { %1445 = vmatprep.mubr.msk.bf16.mxu0 %vm1881_vm1, %v1880_v24  ;;  %1442 = vmatpush3.bf16.msra.mxu0 %v1577_v40 }
 0x59b   : > { %1443 = vmatprep.subr.bf16.mxu0 %v1880_v24 }
 0x59e   : > { %1444 = vmatpush3.bf16.msra.mxu0 %v1578_v41 }
 0x5a9   : > { %v874_v3 = vpop.f32.mrf.mxu1 }
 0x5aa   : > { %v1018_v16 = vsel %vm432_vm0, %v874_v3, 0.0 }
 0x5ab   : > { %v1413_v4 = vpop.f32.mrf.mxu1 }
 0x5ad   : > { %v877_v5 = vpop.f32.mrf.mxu1 }
 0x5af   : > { %v1414_v6 = vpop.f32.mrf.mxu1 }
 0x624   : > { %v920_v7 = vpop.f32.mrf.mxu0 }
 0x625   : > { %v1019_v15 = vsel %vm432_vm0, %v920_v7, 0.0 }
 0x626   : > { %v1419_v8 = vpop.f32.mrf.mxu0  ;;  %v1020_v18 = vadd.f32 %v1019_v15, %v1018_v16 }
 0x628   : > { %v923_v9 = vpop.f32.mrf.mxu0  ;;  %v966_v10 = vpop.f32.mrf.mxu1 }
 0x629   : > { %v1021_v17 = vsel %vm432_vm0, %v966_v10, 0.0 }
 0x62a   : > { %v1420_v11 = vpop.f32.mrf.mxu0  ;;  %v1425_v12 = vpop.f32.mrf.mxu1  ;;  %v1022_v19 = vadd.f32 %v1021_v17, %v1020_v18 }
 0x62c   : > { %v969_v13 = vpop.f32.mrf.mxu1 }
 0x62e   : > { %v1426_v14 = vpop.f32.mrf.mxu1 }
 0x659   : > { %v1012_v20 = vpop.f32.mrf.mxu0 }
 0x65a   : > { %v1023_v22 = vsel %vm432_vm0, %v1012_v20, 0.0 }
 0x65b   : > { %v1024_v23 = vadd.f32 %v1023_v22, %v1022_v19  ;;  %v1431_v25 = vpop.f32.mrf.mxu0 }
 0x65d   : > { %v1025_v26 = vadd.f32 %v1024_v23, %v2123_v0  ;;  %v1015_v27 = vpop.f32.mrf.mxu0  ;;  %v1351_v0 = vld [vmem:[%s2276_s6] ss:$0 sm:$0xff] }
 0x65f   : > { %v1432_v28 = vpop.f32.mrf.mxu0  ;;  %v1026_v29 = vmul.f32 %v1025_v26, %v1025_v26 }
 0x661   : > { %v1027_v30 = vsel %vm432_vm0, %v1026_v29, 0.0 }
 0x662   : > { %1028 = vadd.xlane.f32.xlu0 %v1027_v30 }
 0x6eb   : > { %v1029_v33 = vpop.xlane.xlu0 %1028 }
 0x6ec   : > { %v1030_v34 = vmul.f32 0.03125, %v1029_v33 }
 0x6ee   : > { %v1031_v35 = vadd.f32 1e-05, %v1030_v34 }
 0x6f0   : > { %1597 = vrsqrt.f32 %v1031_v35 }
 0x6fd   : > { %v1598_v36 = vpop.eup %1597 }
 0x6fe   : > { %v1033_v37 = vmul.f32 %v1598_v36, %v1025_v26 }
 0x700   : > { %v1041_v38 = vmul.f32 %v1351_v0, %v1033_v37 }
 0x702   : > { %v1042_v39 = vpack.c.bf16 %v1041_v38, %v1041_v38 }
 0x704   : > { %1438 = vmatmul.mubr.msk.bf16.vlgmr.msra.gmra.mxu1 %vm432_vm0, %v1042_v39 }
 0x7c4   : > { %v1096_v42 = vpop.f32.mrf.mxu1 }
 0x7c5   : > { %1110 = vrot.lane.b32.xlu1 %v1096_v42, %s1878_s16  ;;  %v1355_v46 = vmul.f32 -1.442695, %v1096_v42  ;;  %s2226_s16 = scalar_lea.hbm %s2279_s9, %s1360_s17 }
 0x7c6   : > { %v1439_v43 = vpop.f32.mrf.mxu1 }
 0x7c7   : > { %1599 = vpow2.f32 %v1355_v46 }
 0x7c8   : > { %v1099_v44 = vpop.f32.mrf.mxu1 }
 0x7ca   : > { %v1440_v45 = vpop.f32.mrf.mxu1 }
 0x7d4   : > { %v1600_v47 = vpop.eup %1599 }
 0x7d5   : > { %v1105_v48 = vadd.f32 1.0, %v1600_v47 }
 0x7d7   : > { %1601 = vrcp.f32 %v1105_v48 }
 0x7e4   : > { %v1602_v49 = vpop.eup %1601 }
 0x7e5   : > { %v1108_v50 = vmul.f32 %v1602_v49, %v1096_v42 }
 0x837   : > { %v1111_v51 = vpop.permute.xlu1 %1110 }
 0x838   : > { %v1113_v24 = vmul.f32 %v1111_v51, %v1108_v50 }
 0x83a   : > { %v1114_v52 = vpack.c.bf16 %v1113_v24, %v1113_v24 }
 0x83c   : > { %1446 = vmatmul.mubr.msk.bf16.vlgmr.msra.gmra.mxu0 %vm432_vm0, %v1114_v52 }
 0x8fc   : > { %v1168_v53 = vpop.f32.mrf.mxu0 }
 0x8fd   : > { %v1174_v54 = vadd.f32 %v1168_v53, %v1025_v26 }
 0x8fe   : > { %v1447_v21 = vpop.f32.mrf.mxu0 }
 0x8ff   : > { %1175 = vst.msk [vmem:[%s428_s14] sm:$0xff] %vm432_vm0, %v1174_v54 }
 0x900   : > { %v1171_v55 = vpop.f32.mrf.mxu0 }
 0x901   : > { %1800 = shalt.err (!%p1797_p10)
}
 0x902   : > { %s1801_s20 = scalar_lea.hbm %s2226_s16, 128  ;;  %s1805_s27 = scalar_lea.hbm %s2279_s9, 256 }
 0x903   : > { %p1802_p6 = scmp.ne.s32.totalorder %s2226_s16, %s1801_s20  ;;  %p1806_p7 = scmp.lt.s32.totalorder %s2226_s16, %s2279_s9 }
 0x904   : > { %p1807_p3 = scmp.lt.s32.totalorder %s1805_s27, %s1801_s20 }
 0x905   : > { %p1803_p11 = pnand %p1802_p6, %p2309_p5 }
 0x906   : > { %p1808_p0 = por %p1807_p3, %p1806_p7 }
 0x907   : > { %p1804_p12 = pneg %p1803_p11 }
 0x909   : > { %p1809_p2 = pnand %p1808_p0, %p1804_p12 }
 0x90b   : > { %1812 = shalt.err (!%p1809_p2)
}
 0x90c   : > { %1475 = dma.vmem_to_hbm [thread:$0]  (%p2309_p5), %s2228_s3, 128, %s2226_s16, %s1177_s15   ;;  %v1448_v56 = vpop.f32.mrf.mxu0 }
 0x90d PF: > { %s1202_s17 = sand.u32 1, %s1851_s30   ;;  %p2310_p8 = scmp.ne.s32.totalorder %s2299_s19, 0 }
 0x90e   : > { %p2311_p9 = scmp.ge.s32.totalorder %s1863_s12, 2  ;;  %s1203_s14 = scalar_lea.sflag [#allocation4], %s1202_s17 }
 0x910   : > { %p1501_p13 = pnand %p2311_p9, %p2310_p8 }
 0x912   : > { %p1502_p1 = pneg %p1501_p13 }
 0x914   : > { %1846 = dma.done.wait (%p1502_p1), %s1203_s14, 128  }
 0x915   : > { %1848 = vsyncadd (%p1502_p1), %s1203_s14, 4294967168  ;;  %p25_p4 = scmp.ge.s32.totalorder %s2038_s22, 4   ;;  %s2312_s30 = smov %s1855_s10 }
 0x916   : > { %s2313_s10 = smov %s1859_s11  ;;  %s2314_s11 = smov %s2049_s29 }
 0x917   : > { %s2315_s12 = smov %s2038_s22  ;;  %27 = sbr.rel (!%p25_p4) target bundleno = 13 (0xd), region = 125 }
 0x91c   :  { %1208 = vsyncpa [#allocation3], 1 }
 0x91d   :  { %1210 = vsyncpa [#allocation3 + $0x1], 1 }
 0x91e   :  { %1211 = vsyncpa [#allocation6], 1 }
 0x91f   :  { %1212 = vsyncpa [#allocation9], 1 }
 0x920   :  { %1213 = vsyncpa [#allocation12], 1 }
 0x921   :  { %1214 = vsyncpa [#allocation4], 1 }
 0x922   :  { %1216 = vsyncpa [#allocation4 + $0x1], 1 }

</bundles_post_ra>
